<compile_context>
chip_gen: v7x
topology: tpu7x:2x2x1
jax: 0.10.0
libtpu: 0.0.40
codegen_flags: <defaults>
</compile_context>

<pallas_src>
import jax
import jax.numpy as jnp
from jax.experimental import pallas as pl
from jax.experimental.pallas import tpu as pltpu


_NEG_BIG = float(-1e30)                 # "minus infinity" that stays NaN-free
_TEXT_RESIDENT_BYTES = 6 * 1024 * 1024  # keep whole bf16 text in VMEM below this
_VMEM_WORKSET_BYTES = 40 * 1024 * 1024  # target per-step working set (v7x-safe)
_VMEM_LIMIT_BYTES = 48 * 1024 * 1024    # < 64 MiB physical VMEM on v7x


def _round_up(x: int, m: int) -> int:
    return (x + m - 1) // m * m


def _choose_tiles(n, m, d, row_tile, col_tile, text_resident_bytes):
    """Pick (tm, tn, n_pad, m_pad).  tn == m_pad (text fully VMEM-resident,
    single column block -> text read from HBM exactly once) whenever the
    padded bf16 text fits the residency budget."""
    m8 = _round_up(m, 8)
    if m8 * d * 2 <= text_resident_bytes:
        tn = m8
    else:
        tn = min(_round_up(col_tile, 128), _round_up(m, 128))
    m_pad = _round_up(m, tn)

    tm = min(_round_up(row_tile, 8), _round_up(n, 8))

    def est_bytes(tm_):
        inputs = 2 * tm_ * d * 2 + 2 * tn * d * 2       # double-buffered bf16 blocks
        temps = 4 * tm_ * tn * 4                         # logits + exp temporaries (f32)
        outs = tm_ * 4 + 4 * tn * 4 + 2 * tm_ * 4        # out blocks + scratch
        return inputs + temps + outs

    while tm > 8 and est_bytes(tm) > _VMEM_WORKSET_BYTES:
        tm = max(8, _round_up(tm // 2, 8))

    n_pad = _round_up(n, tm)
    return tm, tn, n_pad, m_pad


def _make_fused_ce_kernel(tm, tn, tn_c, c_blocks, n_valid, m_valid,
                          n_pad, m_pad):
    need_row_mask = n_pad != n_valid      # padded image rows exist
    need_col_mask = m_pad != m_valid      # padded text rows exist

    def kernel(scale_ref, img_ref, txt_ref,
               row_lse_ref, col_m_ref, col_l_ref,
               m_row, l_row):
        i = pl.program_id(0)              # image-row block   ("parallel")
        j = pl.program_id(1)              # text-column block ("arbitrary")
        last_j = pl.num_programs(1) - 1

        # logits tile on the MXU: bf16 x bf16 -> f32 accumulation.
        scale = scale_ref[0]
        logits = scale * jax.lax.dot_general(
            img_ref[...], txt_ref[...],
            dimension_numbers=(((1,), (1,)), ((), ())),
            preferred_element_type=jnp.float32)                # (tm, tn) f32

        # ---- image -> text: online row LSE over column blocks ------------
        @pl.when(j == 0)
        def _():
            m_row[...] = jnp.full_like(m_row, _NEG_BIG)
            l_row[...] = jnp.zeros_like(l_row)

        if need_col_mask:     # mask padded text rows BEFORE max/exp
            col_ids = j * tn + jax.lax.broadcasted_iota(jnp.int32, (tm, tn), 1)
            masked_r = jnp.where(col_ids < m_valid, logits, _NEG_BIG)
        else:
            masked_r = logits

        m_old = m_row[...]
        m_new = jnp.maximum(m_old, jnp.max(masked_r, axis=1, keepdims=True))
        l_new = l_row[...] * jnp.exp(m_old - m_new) + jnp.sum(
            jnp.exp(masked_r - m_new), axis=1, keepdims=True)
        m_row[...] = m_new
        l_row[...] = l_new

        @pl.when(j == last_j)
        def _():
            row_lse_ref[...] = m_new + jnp.log(l_new)

        # ---- text -> image: per-(row-block, column) partial max / sum-exp.
        # Only columns < N are consumed by the loss, so restrict the work:
        #   * resident text (c_blocks == 1): static lane-aligned slice [:tn_c]
        #   * column-blocked: skip blocks entirely past N via pl.when.
        def col_partials():
            lc = logits[:, :tn_c] if tn_c < tn else logits
            if need_row_mask:  # mask padded image rows BEFORE max/exp
                row_ids = i * tm + jax.lax.broadcasted_iota(
                    jnp.int32, (tm, tn_c), 0)
                lc = jnp.where(row_ids < n_valid, lc, _NEG_BIG)
            cm = jnp.max(lc, axis=0, keepdims=True)             # (1, tn_c)
            col_m_ref[...] = cm
            col_l_ref[...] = jnp.sum(jnp.exp(lc - cm), axis=0, keepdims=True)

        if c_blocks == 1:
            col_partials()
        else:
            pl.when(j * tn < n_valid)(col_partials)

    return kernel


def clip_contrastive_ce(image_features, text_features, logit_scale, *,
                        row_tile=512, col_tile=1024,
                        text_resident_bytes=_TEXT_RESIDENT_BYTES,
                        compute_dtype=jnp.bfloat16):
    """Per-row contrastive CE (labels = arange(N)) in both directions from a
    single streaming N x M logits pass; the logits never touch HBM."""
    n, d = image_features.shape
    m, d2 = text_features.shape
    assert d == d2 and m >= n

    img_c = image_features.astype(compute_dtype)
    txt_c = text_features.astype(compute_dtype)
    scale32 = jnp.asarray(logit_scale, jnp.float32).reshape(())

    tm, tn, n_pad, m_pad = _choose_tiles(
        n, m, d, row_tile, col_tile, text_resident_bytes)
    r_blocks = n_pad // tm
    c_blocks = m_pad // tn
    if c_blocks == 1:
        tn_c = min(tn, _round_up(n, 128))        # only cols < N feed t2i
    else:
        tn_c = tn
    n_cols_out = tn_c if c_blocks == 1 else m_pad

    img_p = img_c if n_pad == n else jnp.pad(img_c, ((0, n_pad - n), (0, 0)))
    txt_p = txt_c if m_pad == m else jnp.pad(txt_c, ((0, m_pad - m), (0, 0)))
    scale_arr = jnp.reshape(scale32, (1,))

    kernel = _make_fused_ce_kernel(tm, tn, tn_c, c_blocks, n, m, n_pad, m_pad)

    row_lse, col_m_part, col_l_part = pl.pallas_call(
        kernel,
        out_shape=(jax.ShapeDtypeStruct((n_pad, 1), jnp.float32),
                   jax.ShapeDtypeStruct((r_blocks, 1, n_cols_out), jnp.float32),
                   jax.ShapeDtypeStruct((r_blocks, 1, n_cols_out), jnp.float32)),
        grid_spec=pltpu.PrefetchScalarGridSpec(
            num_scalar_prefetch=0,
            grid=(r_blocks, c_blocks),
            in_specs=[
                pl.BlockSpec(memory_space=pltpu.MemorySpace.SMEM),    # scale
                pl.BlockSpec((tm, d), lambda i, j: (i, 0)),           # image tile
                pl.BlockSpec((tn, d), lambda i, j: (j, 0)),           # text tile
            ],
            out_specs=(
                pl.BlockSpec((tm, 1), lambda i, j: (i, 0)),           # row LSE
                pl.BlockSpec((None, 1, tn_c), lambda i, j: (i, 0, j)),  # col max
                pl.BlockSpec((None, 1, tn_c), lambda i, j: (i, 0, j)),  # col sumexp
            ),
            scratch_shapes=[
                pltpu.VMEM((tm, 1), jnp.float32),      # running row max
                pltpu.VMEM((tm, 1), jnp.float32),      # running row sum-exp
            ]),
        compiler_params=pltpu.CompilerParams(
            # Row blocks are fully independent now (column LSE is merged in the
            # wrapper), so the row axis can be split across TensorCores (v7x).
            dimension_semantics=("parallel", "arbitrary"),
            vmem_limit_bytes=_VMEM_LIMIT_BYTES),
    )(scale_arr, img_p, txt_p)

    # "Label" logit = diagonal = scale * <img_i, txt_i>; recovered from the
    # same bf16-cast features in O(N*D) — no N x M materialization.
    diag = scale32 * jnp.sum(img_c.astype(jnp.float32) *
                             txt_c[:n].astype(jnp.float32), axis=-1)

    i2mt_ce = row_lse[:n, 0] - diag

    # Merge the per-row-block column partials into the column log-sum-exp.
    cm = col_m_part[:, 0, :n]                      # (r_blocks, n)
    cl = col_l_part[:, 0, :n]
    c_max = jnp.max(cm, axis=0)
    col_lse = c_max + jnp.log(jnp.sum(cl * jnp.exp(cm - c_max[None, :]), axis=0))
    t2i_ce = col_lse - diag
    return i2mt_ce, t2i_ce


def _non_duplic_image_mask(x, chunk=128):
    """mask[i] is True iff no earlier row of x is bitwise identical to row i
    (matches torch.unique(dim=0) first-occurrence semantics; duplicate image
    rows produce bit-identical logits rows).  Chunked so the pairwise compare
    never builds a full (N, N, D) intermediate; chunk=128 keeps the sequential
    lax.map short."""
    n = x.shape[0]
    c = min(chunk, n)
    n_pad = _round_up(n, c)
    xp = jnp.pad(x, ((0, n_pad - n), (0, 0)))
    row_idx = jnp.arange(n_pad).reshape(-1, c)
    all_idx = jnp.arange(n_pad)

    def body(idx):
        rows = xp[idx]                                              # (c, d)
        eq = jnp.all(rows[:, None, :] == xp[None, :, :], axis=-1)   # (c, n_pad)
        earlier = eq & (all_idx[None, :] < idx[:, None])
        return ~jnp.any(earlier, axis=-1)

    return jax.lax.map(body, row_idx).reshape(-1)[:n]


@jax.jit
def clip_loss(image_features, text_features, logit_scale, num_pos_caps):
    """Single-device (world_size == 1) ClipLoss.forward."""
    i2mt_ce, t2i_ce = clip_contrastive_ce(
        image_features, text_features, logit_scale)

    npc = jnp.tile(num_pos_caps.astype(jnp.float32), 2)   # torch 1-D .repeat(2)
    i2mt_loss = jnp.mean(i2mt_ce / npc)

    def masked_mean():
        mask = _non_duplic_image_mask(image_features).astype(jnp.float32)
        return jnp.sum(t2i_ce * mask) / jnp.sum(mask)

    def plain_mean():
        return jnp.mean(t2i_ce)

    t2i_loss = jax.lax.cond(
        jnp.mean(num_pos_caps.astype(jnp.float32)) > 1.0,
        masked_mean, plain_mean)

    return (i2mt_loss + t2i_loss) / 2.0


# ----------------------------- pure-JAX references -------------------------
def _reference_ce(img, txt, scale, compute_dtype=jnp.bfloat16):
    n = img.shape[0]
    img32 = img.astype(compute_dtype).astype(jnp.float32)
    txt32 = txt.astype(compute_dtype).astype(jnp.float32)
    lpi = scale * img32 @ txt32.T
    lpt = scale * txt32 @ img32.T
    idx = jnp.arange(n)
    i2mt = -jax.nn.log_softmax(lpi, axis=-1)[idx, idx]
    t2i = -jax.nn.log_softmax(lpt[:n], axis=-1)[idx, idx]
    return i2mt, t2i


def _reference_clip_loss(img, txt, scale, npc):
    i2mt_ce, t2i_ce = _reference_ce(img, txt, scale)
    w = 1.0 / jnp.tile(npc.astype(jnp.float32), 2)
    i2mt = jnp.mean(i2mt_ce * w)
    if float(jnp.mean(npc)) > 1.0:
        mask = _non_duplic_image_mask(img).astype(jnp.float32)
        t2i = jnp.sum(t2i_ce * mask) / jnp.sum(mask)
    else:
        t2i = jnp.mean(t2i_ce)
    return (i2mt + t2i) / 2.0


if __name__ == "__main__":
    key = jax.random.PRNGKey(0)
    ks = jax.random.split(key, 6)

    def unit(k, shape):
        v = jax.random.normal(k, shape, jnp.float32)
        return v / jnp.linalg.norm(v, axis=-1, keepdims=True)

    logit_scale = jnp.float32(10.0)

    # case 1: N == M == 8, D = 32, num_pos_caps == 1  -> plain t2i branch.
    N, D = 8, 32
    img = unit(ks[0], (N, D))
    txt = unit(ks[1], (N, D))
    npc = jnp.ones((N // 2,), jnp.float32)
    loss = clip_loss(img, txt, logit_scale, npc)
    jax.block_until_ready(loss)
    ref = _reference_clip_loss(img, txt, logit_scale, npc)
    assert loss.shape == () and bool(jnp.isfinite(loss))
    assert abs(float(loss) - float(ref)) < 1e-2, (float(loss), float(ref))

    # case 2: duplicated images + num_pos_caps > 1 -> masked t2i branch.
    img_dup = jnp.concatenate([img[: N // 2], img[: N // 2]], axis=0)
    npc2 = jnp.full((N // 2,), 2.0, jnp.float32)
    loss2 = clip_loss(img_dup, txt, logit_scale, npc2)
    jax.block_until_ready(loss2)
    ref2 = _reference_clip_loss(img_dup, txt, logit_scale, npc2)
    assert bool(jnp.isfinite(loss2))
    assert abs(float(loss2) - float(ref2)) < 1e-2, (float(loss2), float(ref2))

    # case 3: ragged N=6, M=12 -> exercises row/col padding masks.
    img3 = unit(ks[2], (6, D))
    txt3 = unit(ks[3], (12, D))
    npc3 = jnp.ones((3,), jnp.float32)
    loss3 = clip_loss(img3, txt3, logit_scale, npc3)
    jax.block_until_ready(loss3)
    ref3 = _reference_clip_loss(img3, txt3, logit_scale, npc3)
    assert bool(jnp.isfinite(loss3))
    assert abs(float(loss3) - float(ref3)) < 1e-2, (float(loss3), float(ref3))

    # case 4: forced multi-block path (r_blocks=2, c_blocks=3, ragged N and M,
    # pl.when column gating, per-row-block partial merge).
    img4 = unit(ks[4], (13, D))
    txt4 = unit(ks[5], (300, D))
    i2mt4, t2i4 = clip_contrastive_ce(img4, txt4, logit_scale,
                                      row_tile=8, col_tile=128,
                                      text_resident_bytes=0)
    jax.block_until_ready((i2mt4, t2i4))
    ri4, rt4 = _reference_ce(img4, txt4, logit_scale)
    assert bool(jnp.all(jnp.isfinite(i2mt4))) and bool(jnp.all(jnp.isfinite(t2i4)))
    assert float(jnp.max(jnp.abs(i2mt4 - ri4))) < 2e-2
    assert float(jnp.max(jnp.abs(t2i4 - rt4))) < 2e-2

    # case 5: resident text with the static lane-aligned t2i column slice
    # (tn_c = 128 < tn = 384).
    img5 = unit(ks[0], (16, D))
    txt5 = unit(ks[1], (384, D))
    i2mt5, t2i5 = clip_contrastive_ce(img5, txt5, logit_scale)
    jax.block_until_ready((i2mt5, t2i5))
    ri5, rt5 = _reference_ce(img5, txt5, logit_scale)
    assert float(jnp.max(jnp.abs(i2mt5 - ri5))) < 2e-2
    assert float(jnp.max(jnp.abs(t2i5 - rt5))) < 2e-2

    print("KERNEL_OK")
</pallas_src>

<mosaic_0001>
module attributes {stable_mosaic.version = 11 : i64} {
  func.func @kernel(%arg0: i32, %arg1: i32, %arg2: memref<1xf32, #tpu.memory_space<smem>>, %arg3: memref<8x32xbf16, #tpu.memory_space<vmem>>, %arg4: memref<8x32xbf16, #tpu.memory_space<vmem>>, %arg5: memref<8x1xf32, #tpu.memory_space<vmem>>, %arg6: memref<1x1x8xf32, #tpu.memory_space<vmem>>, %arg7: memref<1x1x8xf32, #tpu.memory_space<vmem>>, %arg8: memref<8x1xf32, #tpu.memory_space<vmem>>, %arg9: memref<8x1xf32, #tpu.memory_space<vmem>>) attributes {dimension_semantics = [#tpu.dimension_semantics<parallel>, #tpu.dimension_semantics<arbitrary>], iteration_bounds = array<i64: 1, 1>, scalar_prefetch = 0 : i64, scratch_operands = 2 : i64, tpu.core_type = #tpu.core_type<tc>, window_params = [{transform_indices = @transform_0, window_bounds = array<i64: 1>}, {transform_indices = @transform_1, window_bounds = array<i64: 8, 32>}, {transform_indices = @transform_2, window_bounds = array<i64: 8, 32>}, {transform_indices = @transform_3, window_bounds = array<i64: 8, 1>}, {transform_indices = @transform_4, window_bounds = array<i64: 1, 1, 8>}, {transform_indices = @transform_5, window_bounds = array<i64: 1, 1, 8>}]} {
    %c0 = arith.constant 0 : index
    %0 = memref.load %arg2[%c0] : memref<1xf32, #tpu.memory_space<smem>>
    %c0_0 = arith.constant 0 : index
    %c0_1 = arith.constant 0 : index
    %1 = vector.load %arg3[%c0_0, %c0_1] : memref<8x32xbf16, #tpu.memory_space<vmem>>, vector<8x32xbf16>
    %c0_2 = arith.constant 0 : index
    %c0_3 = arith.constant 0 : index
    %2 = vector.load %arg4[%c0_2, %c0_3] : memref<8x32xbf16, #tpu.memory_space<vmem>>, vector<8x32xbf16>
    %cst = arith.constant dense<0.000000e+00> : vector<8x8xf32>
    %3 = tpu.matmul %1, %2, %cst {dimension_numbers = #tpu.dot_dimension_numbers<[1], [1], [0], [0], [0, 0, 1, 0], [], []>} : vector<8x32xbf16>, vector<8x32xbf16>, vector<8x8xf32> -> vector<8x8xf32>
    %4 = vector.broadcast %0 : f32 to vector<8x8xf32>
    %5 = arith.mulf %4, %3 : vector<8x8xf32>
    %c0_i32 = arith.constant 0 : i32
    %6 = arith.cmpi eq, %arg1, %c0_i32 : i32
    %7 = arith.extui %6 : i1 to i32
    %c0_i32_4 = arith.constant 0 : i32
    %8 = arith.cmpi ne, %7, %c0_i32_4 : i32
    scf.if %8 {
      %cst_25 = arith.constant -1.000000e+30 : f32
      %41 = vector.broadcast %cst_25 : f32 to vector<8x1xf32>
      %c0_26 = arith.constant 0 : index
      %c0_27 = arith.constant 0 : index
      %42 = vector.load %arg8[%c0_26, %c0_27] : memref<8x1xf32, #tpu.memory_space<vmem>>, vector<8x1xf32>
      tpu.vector_store %arg8[%c0_26, %c0_27], %41 {strides = array<i32>} : memref<8x1xf32, #tpu.memory_space<vmem>>, vector<8x1xf32>,
      %cst_28 = arith.constant 0.000000e+00 : f32
      %43 = vector.broadcast %cst_28 : f32 to vector<8x1xf32>
      %c0_29 = arith.constant 0 : index
      %c0_30 = arith.constant 0 : index
      %44 = vector.load %arg9[%c0_29, %c0_30] : memref<8x1xf32, #tpu.memory_space<vmem>>, vector<8x1xf32>
      tpu.vector_store %arg9[%c0_29, %c0_30], %43 {strides = array<i32>} : memref<8x1xf32, #tpu.memory_space<vmem>>, vector<8x1xf32>,
    } else {
    }
    %c0_5 = arith.constant 0 : index
    %c0_6 = arith.constant 0 : index
    %9 = vector.load %arg8[%c0_5, %c0_6] : memref<8x1xf32, #tpu.memory_space<vmem>>, vector<8x1xf32>
    %cst_7 = arith.constant dense<0xFF800000> : vector<8xf32>
    %10 = vector.multi_reduction <maximumf>, %5, %cst_7 [1] : vector<8x8xf32> to vector<8xf32>
    %11 = vector.shape_cast %10 : vector<8xf32> to vector<8x1xf32>
    %12 = arith.maximumf %9, %11 : vector<8x1xf32>
    %c0_8 = arith.constant 0 : index
    %c0_9 = arith.constant 0 : index
    %13 = vector.load %arg9[%c0_8, %c0_9] : memref<8x1xf32, #tpu.memory_space<vmem>>, vector<8x1xf32>
    %14 = arith.subf %9, %12 : vector<8x1xf32>
    %15 = math.exp %14 : vector<8x1xf32>
    %16 = arith.mulf %13, %15 : vector<8x1xf32>
    %17 = vector.broadcast %12 : vector<8x1xf32> to vector<8x8xf32>
    %18 = arith.subf %5, %17 : vector<8x8xf32>
    %19 = math.exp %18 : vector<8x8xf32>
    %cst_10 = arith.constant dense<0.000000e+00> : vector<8xf32>
    %20 = vector.multi_reduction <add>, %19, %cst_10 [1] : vector<8x8xf32> to vector<8xf32>
    %21 = vector.shape_cast %20 : vector<8xf32> to vector<8x1xf32>
    %22 = arith.addf %16, %21 : vector<8x1xf32>
    %c0_11 = arith.constant 0 : index
    %c0_12 = arith.constant 0 : index
    %23 = vector.load %arg8[%c0_11, %c0_12] : memref<8x1xf32, #tpu.memory_space<vmem>>, vector<8x1xf32>
    tpu.vector_store %arg8[%c0_11, %c0_12], %12 {strides = array<i32>} : memref<8x1xf32, #tpu.memory_space<vmem>>, vector<8x1xf32>,
    %c0_13 = arith.constant 0 : index
    %c0_14 = arith.constant 0 : index
    %24 = vector.load %arg9[%c0_13, %c0_14] : memref<8x1xf32, #tpu.memory_space<vmem>>, vector<8x1xf32>
    tpu.vector_store %arg9[%c0_13, %c0_14], %22 {strides = array<i32>} : memref<8x1xf32, #tpu.memory_space<vmem>>, vector<8x1xf32>,
    %c0_i32_15 = arith.constant 0 : i32
    %25 = arith.cmpi eq, %arg1, %c0_i32_15 : i32
    %26 = arith.extui %25 : i1 to i32
    %c0_i32_16 = arith.constant 0 : i32
    %27 = arith.cmpi ne, %26, %c0_i32_16 : i32
    scf.if %27 {
      %41 = math.log %22 : vector<8x1xf32>
      %42 = arith.addf %12, %41 : vector<8x1xf32>
      %c0_25 = arith.constant 0 : index
      %c0_26 = arith.constant 0 : index
      %43 = vector.load %arg5[%c0_25, %c0_26] : memref<8x1xf32, #tpu.memory_space<vmem>>, vector<8x1xf32>
      tpu.vector_store %arg5[%c0_25, %c0_26], %42 {strides = array<i32>} : memref<8x1xf32, #tpu.memory_space<vmem>>, vector<8x1xf32>,
    } else {
    }
    %cst_17 = arith.constant dense<0xFF800000> : vector<8xf32>
    %28 = vector.multi_reduction <maximumf>, %5, %cst_17 [0] : vector<8x8xf32> to vector<8xf32>
    %29 = vector.shape_cast %28 : vector<8xf32> to vector<1x8xf32>
    %c0_18 = arith.constant 0 : index
    %c0_19 = arith.constant 0 : index
    %c0_20 = arith.constant 0 : index
    %30 = vector.load %arg6[%c0_18, %c0_19, %c0_20] : memref<1x1x8xf32, #tpu.memory_space<vmem>>, vector<1x1x8xf32>
    %31 = vector.shape_cast %30 : vector<1x1x8xf32> to vector<1x8xf32>
    %32 = vector.shape_cast %29 : vector<1x8xf32> to vector<1x1x8xf32>
    tpu.vector_store %arg6[%c0_18, %c0_19, %c0_20], %32 {strides = array<i32>} : memref<1x1x8xf32, #tpu.memory_space<vmem>>, vector<1x1x8xf32>,
    %33 = vector.broadcast %29 : vector<1x8xf32> to vector<8x8xf32>
    %34 = arith.subf %5, %33 : vector<8x8xf32>
    %35 = math.exp %34 : vector<8x8xf32>
    %cst_21 = arith.constant dense<0.000000e+00> : vector<8xf32>
    %36 = vector.multi_reduction <add>, %35, %cst_21 [0] : vector<8x8xf32> to vector<8xf32>
    %37 = vector.shape_cast %36 : vector<8xf32> to vector<1x8xf32>
    %c0_22 = arith.constant 0 : index
    %c0_23 = arith.constant 0 : index
    %c0_24 = arith.constant 0 : index
    %38 = vector.load %arg7[%c0_22, %c0_23, %c0_24] : memref<1x1x8xf32, #tpu.memory_space<vmem>>, vector<1x1x8xf32>
    %39 = vector.shape_cast %38 : vector<1x1x8xf32> to vector<1x8xf32>
    %40 = vector.shape_cast %37 : vector<1x8xf32> to vector<1x1x8xf32>
    tpu.vector_store %arg7[%c0_22, %c0_23, %c0_24], %40 {strides = array<i32>} : memref<1x1x8xf32, #tpu.memory_space<vmem>>, vector<1x1x8xf32>,
    return
  }
  func.func @transform_0(%arg0: i32, %arg1: i32) -> i32 {
    %c0_i32 = arith.constant 0 : i32
    %c0_i32_0 = arith.constant 0 : i32
    return %c0_i32 : i32
  }
  func.func @transform_1(%arg0: i32, %arg1: i32) -> (i32, i32) {
    %c0_i32 = arith.constant 0 : i32
    %c0_i32_0 = arith.constant 0 : i32
    return %arg0, %c0_i32 : i32, i32
  }
  func.func @transform_2(%arg0: i32, %arg1: i32) -> (i32, i32) {
    %c0_i32 = arith.constant 0 : i32
    %c0_i32_0 = arith.constant 0 : i32
    return %arg1, %c0_i32 : i32, i32
  }
  func.func @transform_3(%arg0: i32, %arg1: i32) -> (i32, i32) {
    %c0_i32 = arith.constant 0 : i32
    %c0_i32_0 = arith.constant 0 : i32
    return %arg0, %c0_i32 : i32, i32
  }
  func.func @transform_4(%arg0: i32, %arg1: i32) -> (i32, i32, i32) {
    %c0_i32 = arith.constant 0 : i32
    %c0_i32_0 = arith.constant 0 : i32
    return %arg0, %c0_i32, %arg1 : i32, i32, i32
  }
  func.func @transform_5(%arg0: i32, %arg1: i32) -> (i32, i32, i32) {
    %c0_i32 = arith.constant 0 : i32
    %c0_i32_0 = arith.constant 0 : i32
    return %arg0, %c0_i32, %arg1 : i32, i32, i32
  }
}

</mosaic_0001>

<bundles_post_ra>
// kernel: clip_loss.1
= control target key start
LH: loop header
LB: loop body
LE: loop exit
PB: predicated region body
PF: predicated region fallthrough
CT: control target
= control target key end

     0   :  { %vm75_vm0 = vcmask 7168   ;;  %vm22_vm1 = vcmask 261120   ;;  %v164_v0 = vmov 0.0   ;;  %vm165_vm2 = vmmov 0   ;;  %s226_s2 = inlined_call_operand.vmem [shape: bf16[8,32], index: 2, kind: input, shape index: {}]   ;;  %s227_s1 = inlined_call_operand.vmem [shape: bf16[8,32], index: 1, kind: input, shape index: {}]   ;;  %s228_s0 = inlined_call_operand.<no memory space> [shape: f32[1], index: 0, kind: input, shape index: {}]   ;;  %s229_s4 = inlined_call_operand.vmem [shape: f32[1,1,8], index: 4, kind: output, shape index: {1}]   ;;  %s230_s5 = inlined_call_operand.vmem [shape: f32[1,1,8], index: 5, kind: output, shape index: {2}]   ;;  %s231_s3 = inlined_call_operand.vmem [shape: f32[8,1], index: 3, kind: output, shape index: {0}]  }
   0x1   :  { %145 = vmatprep.subr.bf16.mxu0 %v164_v0  ;;  %77 = vst.msk [vmem:[#allocation3] sm:$0xff] %vm75_vm0, %v164_v0  ;;  %v21_v1 = vld [vmem:[%s226_s2] sm:$0xf]  ;;  %147 = vmatprep.mubr.msk.bf16.mxu0 %vm165_vm2, %v164_v0  ;;  %v166_v4 = vmov -1e+30   ;;  %v69_v5 = vstv %s228_s0  ;;  %vm79_vm3 = vcmask 64512  }
   0x2   :  { %v27_v2 = vsel %vm22_vm1, %v21_v1, 0  ;;  %v20_v3 = vld [vmem:[%s227_s1] sm:$0xf]  ;;  %76 = vst.msk [vmem:[#allocation2] sm:$0xff] %vm75_vm0, %v166_v4  ;;  %vm117_vm4 = vcmask 57344   ;;  %v167_v20 = vmov 0  }
   0x3   :  { %146 = vmatpush3.bf16.xpose.msra.mxu0 %v27_v2  ;;  %155 = vset.pattern.permute.xlu0 %v167_v20 }
   0x8   :  { %v84_v40 = vld [vmem:[#allocation3] sm:$0xff] }
   0x9   :  { %v78_v29 = vld [vmem:[#allocation2] sm:$0xff] }
   0xa   :  { %148 = vmatmul.mubr.msk.bf16.vlgmr.msra.gmra.mrb[0].mxu0 %vm22_vm1, %v20_v3 }
  0xdd   :  { %v63_v6 = vpop.f32.mrb[0].mxu0 }
  0xde   :  { %v70_v7 = vmul.f32 %v69_v5, %v63_v6  ;;  %v149_v8 = vpop.f32.mrb[1].mxu0 }
  0xdf   :  { %v66_v9 = vpop.f32.mrb[2].mxu0 }
  0xe0   :  { %v150_v10 = vpop.f32.mrb[3].mxu0  ;;  %v80_v11 = vsel %vm79_vm3, %v70_v7, -inf }
  0xe1   :  { %81 = vmax.xlane.f32.xlu0 %v80_v11  ;;  %v111_v12 = vrot.slane %v80_v11, 4 }
  0xe3   :  { %v112_v13 = vmax.f32 %v80_v11, %v111_v12 }
  0xe5   :  { %v113_v14 = vrot.slane %v112_v13, 2 }
  0xe7   :  { %v114_v15 = vmax.f32 %v112_v13, %v113_v14 }
  0xe9   :  { %v115_v16 = vrot.slane %v114_v15, 1 }
  0xeb   :  { %v116_v17 = vmax.f32 %v114_v15, %v115_v16 }
  0xed   :  { %118 = vst.msk [vmem:[%s229_s4] sm:$0x1] %vm117_vm4, %v116_v17  ;;  %v119_v18 = vsub.f32 %v70_v7, %v116_v17 }
  0xef   :  { %v120_v19 = vmul.f32 1.442695, %v119_v18 }
  0xf1   :  { %156 = vpow2.f32 %v120_v19 }
  0xfb   :  { %v157_v21 = vpop.eup %156 }
  0xfc   :  { %v122_v22 = vsel %vm79_vm3, %v157_v21, 0.0 }
  0xfd   :  { %v123_v23 = vrot.slane %v122_v22, 4 }
  0xff   :  { %v124_v24 = vadd.f32 %v123_v23, %v122_v22 }
 0x101   :  { %v125_v25 = vrot.slane %v124_v24, 2 }
 0x103   :  { %v126_v26 = vadd.f32 %v125_v25, %v124_v24 }
 0x105   :  { %v127_v27 = vrot.slane %v126_v26, 1 }
 0x107   :  { %v128_v28 = vadd.f32 %v127_v27, %v126_v26 }
 0x109   :  { %129 = vst.msk [vmem:[%s230_s5] sm:$0x1] %vm117_vm4, %v128_v28 }
 0x16e   :  { %v82_v30 = vpop.xlane.xlu0 %81 }
 0x16f   :  { %v83_v31 = vmax.f32 %v78_v29, %v82_v30 }
 0x171   :  { %102 = vst.msk [vmem:[#allocation2] sm:$0xff] %vm75_vm0, %v83_v31  ;;  %91 = vperm.xlu0 %155, %v83_v31   ;;  %v85_v37 = vsub.f32 %v78_v29, %v83_v31 }
 0x173   :  { %v86_v38 = vmul.f32 1.442695, %v85_v37 }
 0x1f0   :  { %v92_v32 = vpop.permute.xlu0 %91 }
 0x1f1   :  { %v94_v33 = vsub.f32 %v70_v7, %v92_v32 }
 0x1f3   :  { %v95_v34 = vmul.f32 1.442695, %v94_v33 }
 0x1f5   :  { %158 = vpow2.f32 %v95_v34 }
 0x1f6   :  { %160 = vpow2.f32 %v86_v38 }
 0x1ff   :  { %v159_v35 = vpop.eup %158 }
 0x200   :  { %v97_v36 = vsel %vm79_vm3, %v159_v35, 0.0  ;;  %v161_v39 = vpop.eup %160 }
 0x201   :  { %98 = vadd.xlane.f32.xlu1 %v97_v36  ;;  %v88_v41 = vmul.f32 %v161_v39, %v84_v40 }
 0x28e   :  { %v99_v42 = vpop.xlane.xlu1 %98 }
 0x28f   :  { %v100_v43 = vadd.f32 %v99_v42, %v88_v41 }
 0x291   :  { %103 = vst.msk [vmem:[#allocation3] sm:$0xff] %vm75_vm0, %v100_v43  ;;  %162 = vlog2.f32 %v100_v43 }
 0x29b   :  { %v163_v44 = vpop.eup %162 }
 0x29c   :  { %v108_v45 = vmul.f32 0.6931472, %v163_v44 }
 0x29e   :  { %v109_v46 = vadd.f32 %v108_v45, %v83_v31 }
 0x2a0   :  { %110 = vst.msk [vmem:[%s231_s3] sm:$0xff] %vm75_vm0, %v109_v46 }

</bundles_post_ra>
